<compile_context>
chip_gen: v6e
topology: v6e:2x2x1
jax: 0.10.0
libtpu: 0.0.40
codegen_flags: <defaults>
</compile_context>

<pallas_src>
import jax
import jax.numpy as jnp
from jax import lax
from jax.experimental import pallas as pl
from jax.experimental.pallas import tpu as pltpu


# --------------------------------------------------------------------------
# Pallas kernel: embedding gather (one-hot matmul) + tanh RNN + final Linear.
# --------------------------------------------------------------------------
def rnn_classify_kernel(ids_ref,       # (T*B, 1) int32, time-major (row = t*B + b)
                        emb_proj_ref,  # (V, D)   E @ W_ih^T + (b_ih + b_hh)
                        whh_ref,       # (D, D)   W_hh^T
                        wcls_ref,      # (D, 128) classifier weight^T, zero-padded
                        bcls_ref,      # (1, 128) classifier bias, zero-padded
                        out_ref):      # (B, 128) padded logits (lane-dense store)
    TB = ids_ref.shape[0]
    B = out_ref.shape[0]
    T = TB // B
    V, D = emb_proj_ref.shape

    # Fused embedding lookup + input projection (+ biases) for ALL timesteps:
    # one (T*B, V) @ (V, D) matmul instead of T serialized (B, D) @ (D, D) dots.
    ids = ids_ref[...]                                           # (T*B, 1) int32
    iota_v = lax.broadcasted_iota(jnp.int32, (TB, V), 1)
    one_hot = (iota_v == ids).astype(jnp.float32)                # (T*B, V)
    x_proj = jnp.dot(one_hot, emb_proj_ref[...],
                     preferred_element_type=jnp.float32)         # (T*B, D)

    # Serial recurrence: only the h-side matmul + tanh remain on the critical
    # path.  Statically unrolled so the scheduler sees across iterations.
    whh = whh_ref[...]
    h = jnp.zeros((B, D), jnp.float32)
    for t in range(T):                      # T is a compile-time constant
        x_t = x_proj[t * B:(t + 1) * B, :]  # static slice, bias already folded in
        h = jnp.tanh(x_t + jnp.dot(h, whh, preferred_element_type=jnp.float32))

    # Classifier; 128-wide zero-padded output -> unmasked lane-dense store.
    logits = jnp.dot(h, wcls_ref[...],
                     preferred_element_type=jnp.float32) + bcls_ref[...]
    out_ref[...] = logits.astype(out_ref.dtype)


# --------------------------------------------------------------------------
# Wrappers (jitted so the tiny id-transpose / output-slice / loss fuse with
# the custom call into a single dispatched executable).
# --------------------------------------------------------------------------
def _rnn_forward_logits(x_ids, emb_proj, whh_t, wcls_pad, bcls_pad, num_classes):
    B, T = x_ids.shape
    V, D = emb_proj.shape
    c_pad = wcls_pad.shape[1]

    # time-major flatten of the (B, T) ids -> (T*B, 1); 16 int32s, fused by jit.
    ids_col = x_ids.T.reshape(T * B, 1).astype(jnp.int32)

    flops = 2 * (T * B * V * D + T * B * D * D + B * D * c_pad)
    bytes_accessed = 4 * (T * B + V * D + D * D + D * c_pad + c_pad + B * c_pad)

    vmem = pl.BlockSpec(memory_space=pltpu.MemorySpace.VMEM)
    logits_pad = pl.pallas_call(
        rnn_classify_kernel,
        out_shape=jax.ShapeDtypeStruct((B, c_pad), jnp.float32),
        in_specs=[vmem] * 5,
        out_specs=vmem,
        compiler_params=pltpu.CompilerParams(vmem_limit_bytes=16 * 1024 * 1024),
        cost_estimate=pl.CostEstimate(flops=flops,
                                      transcendentals=T * B * D,
                                      bytes_accessed=bytes_accessed),
    )(ids_col, emb_proj, whh_t, wcls_pad, bcls_pad)
    return logits_pad[:, :num_classes]


def _rnn_forward_loss(x_ids, y, emb_proj, whh_t, wcls_pad, bcls_pad, num_classes):
    y_pred = _rnn_forward_logits(x_ids, emb_proj, whh_t, wcls_pad, bcls_pad,
                                 num_classes)
    # Cross-entropy with integer targets (mean reduction), fused by jit.
    logz = jax.nn.logsumexp(y_pred, axis=-1)
    picked = jnp.take_along_axis(y_pred, y[:, None], axis=-1)[:, 0]
    return jnp.mean(logz - picked)


_rnn_forward_logits_jit = jax.jit(_rnn_forward_logits,
                                  static_argnames=("num_classes",))
_rnn_forward_loss_jit = jax.jit(_rnn_forward_loss,
                                static_argnames=("num_classes",))


# --------------------------------------------------------------------------
# TorchModel equivalent (forward pass).
# --------------------------------------------------------------------------
class PallasTorchModel:
    C_PAD = 128  # lane-dense padded classifier width

    def __init__(self, vector_dim, sentence_length, vocab_size, key):
        D, L, V = vector_dim, sentence_length, vocab_size
        ks = jax.random.split(key, 6)
        scale = 1.0 / jnp.sqrt(D)
        # nn.Embedding(len(vocab), vector_dim, padding_idx=0)
        emb = jax.random.normal(ks[0], (V, D), jnp.float32)
        self.embedding = emb.at[0].set(0.0)           # padding_idx=0 row zeroed
        # nn.RNN(vector_dim, vector_dim, batch_first=True), single layer, tanh
        self.w_ih = jax.random.uniform(ks[1], (D, D), jnp.float32, -scale, scale)
        self.w_hh = jax.random.uniform(ks[2], (D, D), jnp.float32, -scale, scale)
        self.b_ih = jax.random.uniform(ks[3], (D,), jnp.float32, -scale, scale)
        self.b_hh = jax.random.uniform(ks[4], (D,), jnp.float32, -scale, scale)
        # nn.Linear(vector_dim, sentence_length + 1)
        self.w_cls = jax.random.uniform(ks[5], (L + 1, D), jnp.float32, -scale, scale)
        self.b_cls = jnp.zeros((L + 1,), jnp.float32)
        self.num_classes = L + 1

        # ---- pre-folded kernel operands (done once; weights are static) ----
        # embedding lookup + x-projection + both biases folded into one table
        self.emb_proj = (self.embedding @ self.w_ih.T
                         + (self.b_ih + self.b_hh)[None, :])          # (V, D)
        self.whh_t = self.w_hh.T                                      # (D, D)
        self.wcls_pad = (jnp.zeros((D, self.C_PAD), jnp.float32)
                         .at[:, :self.num_classes].set(self.w_cls.T)) # (D, 128)
        self.bcls_pad = (jnp.zeros((1, self.C_PAD), jnp.float32)
                         .at[0, :self.num_classes].set(self.b_cls))   # (1, 128)

    def forward(self, x, y=None):
        if y is not None:
            return _rnn_forward_loss_jit(x, y, self.emb_proj, self.whh_t,
                                         self.wcls_pad, self.bcls_pad,
                                         num_classes=self.num_classes)
        return _rnn_forward_logits_jit(x, self.emb_proj, self.whh_t,
                                       self.wcls_pad, self.bcls_pad,
                                       num_classes=self.num_classes)

    # Pure-JAX reference (mirrors PyTorch semantics) for correctness checking.
    def forward_ref(self, x):
        x_emb = self.embedding[x]
        B, T, D = x_emb.shape
        h = jnp.zeros((B, D), jnp.float32)
        for t in range(T):
            h = jnp.tanh(x_emb[:, t, :] @ self.w_ih.T + self.b_ih
                         + h @ self.w_hh.T + self.b_hh)
        return h @ self.w_cls.T + self.b_cls


if __name__ == "__main__":
    vector_dim = 32
    sentence_length = 8
    vocab_size = 28          # e.g. 26 letters + pad + unk
    batch = 2

    key = jax.random.PRNGKey(0)
    k_param, k_x, k_y = jax.random.split(key, 3)

    model = PallasTorchModel(vector_dim, sentence_length, vocab_size, k_param)

    x = jax.random.randint(k_x, (batch, sentence_length), 0, vocab_size, jnp.int32)
    y = jax.random.randint(k_y, (batch,), 0, sentence_length + 1, jnp.int32)

    y_pred = jax.block_until_ready(model.forward(x))

    # Cross-check against pure-JAX reference.
    ref = jax.block_until_ready(model.forward_ref(x))
    assert y_pred.shape == (batch, sentence_length + 1)
    assert jnp.allclose(y_pred, ref, atol=1e-4, rtol=1e-4)

    # Loss branch (y provided) runs the same fused kernel + jit-fused CE.
    loss = jax.block_until_ready(model.forward(x, y))
    assert loss.shape == ()

    # TODO(synk): cross-entropy stays as (jit-fused) JAX glue outside the kernel;
    # nn.AvgPool1d in the original module is unused by its forward and is omitted.
    print("KERNEL_OK")
</pallas_src>

<mosaic_0001>
module attributes {stable_mosaic.version = 11 : i64} {
  func.func @rnn_classify_kernel(%arg0: memref<16x1xi32, #tpu.memory_space<vmem>>, %arg1: memref<28x32xf32, #tpu.memory_space<vmem>>, %arg2: memref<32x32xf32, #tpu.memory_space<vmem>>, %arg3: memref<32x128xf32, #tpu.memory_space<vmem>>, %arg4: memref<1x128xf32, #tpu.memory_space<vmem>>, %arg5: memref<2x128xf32, #tpu.memory_space<vmem>>) attributes {dimension_semantics = [], scalar_prefetch = 0 : i64, scratch_operands = 0 : i64, tpu.core_type = #tpu.core_type<tc>} {
    %c0 = arith.constant 0 : index
    %c0_0 = arith.constant 0 : index
    %0 = vector.load %arg0[%c0, %c0_0] : memref<16x1xi32, #tpu.memory_space<vmem>>, vector<16x1xi32>
    %1 = tpu.iota {dimensions = array<i32: 1>} : vector<16x28xi32>
    %2 = vector.broadcast %0 : vector<16x1xi32> to vector<16x28xi32>
    %3 = arith.cmpi eq, %1, %2 : vector<16x28xi32>
    %4 = arith.extui %3 : vector<16x28xi1> to vector<16x28xi32>
    %5 = arith.sitofp %4 : vector<16x28xi32> to vector<16x28xf32>
    %c0_1 = arith.constant 0 : index
    %c0_2 = arith.constant 0 : index
    %6 = vector.load %arg1[%c0_1, %c0_2] : memref<28x32xf32, #tpu.memory_space<vmem>>, vector<28x32xf32>
    %cst = arith.constant dense<0.000000e+00> : vector<16x32xf32>
    %7 = tpu.matmul %5, %6, %cst {dimension_numbers = #tpu.dot_dimension_numbers<[1], [0], [0], [1], [0, 0, 1, 1], [], []>} : vector<16x28xf32>, vector<28x32xf32>, vector<16x32xf32> -> vector<16x32xf32>
    %c0_3 = arith.constant 0 : index
    %c0_4 = arith.constant 0 : index
    %8 = vector.load %arg2[%c0_3, %c0_4] : memref<32x32xf32, #tpu.memory_space<vmem>>, vector<32x32xf32>
    %cst_5 = arith.constant 0.000000e+00 : f32
    %9 = vector.broadcast %cst_5 : f32 to vector<2x32xf32>
    %10 = vector.extract_strided_slice %7 {offsets = [0, 0], sizes = [2, 32], strides = [1, 1]} : vector<16x32xf32> to vector<2x32xf32>
    %cst_6 = arith.constant dense<0.000000e+00> : vector<2x32xf32>
    %11 = tpu.matmul %9, %8, %cst_6 {dimension_numbers = #tpu.dot_dimension_numbers<[1], [0], [0], [1], [0, 0, 1, 1], [], []>} : vector<2x32xf32>, vector<32x32xf32>, vector<2x32xf32> -> vector<2x32xf32>
    %12 = arith.addf %10, %11 : vector<2x32xf32>
    %13 = math.tanh %12 : vector<2x32xf32>
    %14 = vector.extract_strided_slice %7 {offsets = [2, 0], sizes = [2, 32], strides = [1, 1]} : vector<16x32xf32> to vector<2x32xf32>
    %cst_7 = arith.constant dense<0.000000e+00> : vector<2x32xf32>
    %15 = tpu.matmul %13, %8, %cst_7 {dimension_numbers = #tpu.dot_dimension_numbers<[1], [0], [0], [1], [0, 0, 1, 1], [], []>} : vector<2x32xf32>, vector<32x32xf32>, vector<2x32xf32> -> vector<2x32xf32>
    %16 = arith.addf %14, %15 : vector<2x32xf32>
    %17 = math.tanh %16 : vector<2x32xf32>
    %18 = vector.extract_strided_slice %7 {offsets = [4, 0], sizes = [2, 32], strides = [1, 1]} : vector<16x32xf32> to vector<2x32xf32>
    %cst_8 = arith.constant dense<0.000000e+00> : vector<2x32xf32>
    %19 = tpu.matmul %17, %8, %cst_8 {dimension_numbers = #tpu.dot_dimension_numbers<[1], [0], [0], [1], [0, 0, 1, 1], [], []>} : vector<2x32xf32>, vector<32x32xf32>, vector<2x32xf32> -> vector<2x32xf32>
    %20 = arith.addf %18, %19 : vector<2x32xf32>
    %21 = math.tanh %20 : vector<2x32xf32>
    %22 = vector.extract_strided_slice %7 {offsets = [6, 0], sizes = [2, 32], strides = [1, 1]} : vector<16x32xf32> to vector<2x32xf32>
    %cst_9 = arith.constant dense<0.000000e+00> : vector<2x32xf32>
    %23 = tpu.matmul %21, %8, %cst_9 {dimension_numbers = #tpu.dot_dimension_numbers<[1], [0], [0], [1], [0, 0, 1, 1], [], []>} : vector<2x32xf32>, vector<32x32xf32>, vector<2x32xf32> -> vector<2x32xf32>
    %24 = arith.addf %22, %23 : vector<2x32xf32>
    %25 = math.tanh %24 : vector<2x32xf32>
    %26 = vector.extract_strided_slice %7 {offsets = [8, 0], sizes = [2, 32], strides = [1, 1]} : vector<16x32xf32> to vector<2x32xf32>
    %cst_10 = arith.constant dense<0.000000e+00> : vector<2x32xf32>
    %27 = tpu.matmul %25, %8, %cst_10 {dimension_numbers = #tpu.dot_dimension_numbers<[1], [0], [0], [1], [0, 0, 1, 1], [], []>} : vector<2x32xf32>, vector<32x32xf32>, vector<2x32xf32> -> vector<2x32xf32>
    %28 = arith.addf %26, %27 : vector<2x32xf32>
    %29 = math.tanh %28 : vector<2x32xf32>
    %30 = vector.extract_strided_slice %7 {offsets = [10, 0], sizes = [2, 32], strides = [1, 1]} : vector<16x32xf32> to vector<2x32xf32>
    %cst_11 = arith.constant dense<0.000000e+00> : vector<2x32xf32>
    %31 = tpu.matmul %29, %8, %cst_11 {dimension_numbers = #tpu.dot_dimension_numbers<[1], [0], [0], [1], [0, 0, 1, 1], [], []>} : vector<2x32xf32>, vector<32x32xf32>, vector<2x32xf32> -> vector<2x32xf32>
    %32 = arith.addf %30, %31 : vector<2x32xf32>
    %33 = math.tanh %32 : vector<2x32xf32>
    %34 = vector.extract_strided_slice %7 {offsets = [12, 0], sizes = [2, 32], strides = [1, 1]} : vector<16x32xf32> to vector<2x32xf32>
    %cst_12 = arith.constant dense<0.000000e+00> : vector<2x32xf32>
    %35 = tpu.matmul %33, %8, %cst_12 {dimension_numbers = #tpu.dot_dimension_numbers<[1], [0], [0], [1], [0, 0, 1, 1], [], []>} : vector<2x32xf32>, vector<32x32xf32>, vector<2x32xf32> -> vector<2x32xf32>
    %36 = arith.addf %34, %35 : vector<2x32xf32>
    %37 = math.tanh %36 : vector<2x32xf32>
    %38 = vector.extract_strided_slice %7 {offsets = [14, 0], sizes = [2, 32], strides = [1, 1]} : vector<16x32xf32> to vector<2x32xf32>
    %cst_13 = arith.constant dense<0.000000e+00> : vector<2x32xf32>
    %39 = tpu.matmul %37, %8, %cst_13 {dimension_numbers = #tpu.dot_dimension_numbers<[1], [0], [0], [1], [0, 0, 1, 1], [], []>} : vector<2x32xf32>, vector<32x32xf32>, vector<2x32xf32> -> vector<2x32xf32>
    %40 = arith.addf %38, %39 : vector<2x32xf32>
    %41 = math.tanh %40 : vector<2x32xf32>
    %c0_14 = arith.constant 0 : index
    %c0_15 = arith.constant 0 : index
    %42 = vector.load %arg3[%c0_14, %c0_15] : memref<32x128xf32, #tpu.memory_space<vmem>>, vector<32x128xf32>
    %cst_16 = arith.constant dense<0.000000e+00> : vector<2x128xf32>
    %43 = tpu.matmul %41, %42, %cst_16 {dimension_numbers = #tpu.dot_dimension_numbers<[1], [0], [0], [1], [0, 0, 1, 1], [], []>} : vector<2x32xf32>, vector<32x128xf32>, vector<2x128xf32> -> vector<2x128xf32>
    %c0_17 = arith.constant 0 : index
    %c0_18 = arith.constant 0 : index
    %44 = vector.load %arg4[%c0_17, %c0_18] : memref<1x128xf32, #tpu.memory_space<vmem>>, vector<1x128xf32>
    %45 = vector.broadcast %44 : vector<1x128xf32> to vector<2x128xf32>
    %46 = arith.addf %43, %45 : vector<2x128xf32>
    %c0_19 = arith.constant 0 : index
    %c0_20 = arith.constant 0 : index
    %47 = vector.load %arg5[%c0_19, %c0_20] : memref<2x128xf32, #tpu.memory_space<vmem>>, vector<2x128xf32>
    tpu.vector_store %arg5[%c0_19, %c0_20], %46 {strides = array<i32>} : memref<2x128xf32, #tpu.memory_space<vmem>>, vector<2x128xf32>,
    return
  }
}

</mosaic_0001>

<bundles_post_ra>
// kernel: _rnn_forward_logits.1
= control target key start
LH: loop header
LB: loop body
LE: loop exit
PB: predicated region body
PF: predicated region fallthrough
CT: control target
= control target key end

     0   :  { %10 = vsyncpa [#allocation3], 0  ;;  %s1330_s0 = inlined_call_operand.vmem [shape: s32[16,1], index: 0, kind: input, shape index: {}]   ;;  %s1331_s1 = inlined_call_operand.vmem [shape: f32[28,32], index: 1, kind: input, shape index: {}]   ;;  %s1332_s2 = inlined_call_operand.hbm [shape: f32[32,32], index: 2, kind: input, shape index: {}]   ;;  %s1333_s3 = inlined_call_operand.hbm [shape: f32[32,128], index: 3, kind: input, shape index: {}]   ;;  %s1334_s4 = inlined_call_operand.vmem [shape: f32[1,128], index: 4, kind: input, shape index: {}]   ;;  %s1335_s5 = inlined_call_operand.hbm [shape: f32[2,128], index: 5, kind: output, shape index: {}]  }
   0x1   :  { %11 = vsyncpa [#allocation6], 0 }
   0x2   :  { %12 = vsyncpa [#allocation4], 0  ;;  %s1151_s18 = smov [#allocation2]  }
   0x3   :  { %s22_s19 = sshll.u32 %s1151_s18, 4  ;;  %s23_s19 = int_to_ptr.vmem [resolvable:$true] %s22_s19 }
   0x4   :  { %s1093_s20 = scalar_lea.vmem %s23_s19, 512  ;;  %p1098_p1 = scmp.lt.s32.totalorder %s23_s19, %s23_s19 }
   0x5   :  { %p1094_p0 = scmp.ne.s32.totalorder %s23_s19, %s1093_s20  ;;  %p1099_p2 = scmp.lt.s32.totalorder %s1093_s20, %s1093_s20 }
   0x7   :  { %p1100_p3 = por %p1099_p2, %p1098_p1 }
   0x9   :  { %p1101_p4 = pnand %p1100_p3, %p1094_p0 }
   0xb   :  { %1104 = shalt.err (!%p1101_p4)
}
   0xc   :  { %s1152_s21 = smov 128   ;;  %s1153_s22 = smov 8  }
   0xd   :  { %28 = dma.hbm_to_vmem [thread:$0]  %s1332_s2, 512, %s23_s19, [#allocation3], %s1152_s21, %s1152_s21, %s1153_s22  }
   0xe   :  { %s1154_s25 = smov [#allocation5]  }
   0xf   :  { %s34_s26 = sshll.u32 %s1154_s25, 4  ;;  %s35_s26 = int_to_ptr.vmem [resolvable:$true] %s34_s26 }
  0x10   :  { %s1113_s27 = scalar_lea.vmem %s35_s26, 512  ;;  %p1118_p6 = scmp.lt.s32.totalorder %s35_s26, %s35_s26 }
  0x11   :  { %p1114_p5 = scmp.ne.s32.totalorder %s35_s26, %s1113_s27  ;;  %p1119_p7 = scmp.lt.s32.totalorder %s1113_s27, %s1113_s27 }
  0x13   :  { %p1120_p8 = por %p1119_p7, %p1118_p6 }
  0x15   :  { %p1121_p9 = pnand %p1120_p8, %p1114_p5 }
  0x17   :  { %1124 = shalt.err (!%p1121_p9)
}
  0x18   :  { %40 = dma.hbm_to_vmem [thread:$0]  %s1333_s3, 512, %s35_s26, [#allocation6], %s1152_s21, %s1152_s21, %s1153_s22  }
  0x19   :  { %1145 = dma.done.wait [#allocation3], 512  }
  0x1a   :  { %1146 = vsyncadd [#allocation3], 4294966784 }
  0x1b   :  { %1147 = dma.done.wait [#allocation6], 512  }
  0x1c   :  { %1148 = vsyncadd [#allocation6], 4294966784  ;;  %v1155_v0 = vmov 0   ;;  %v1156_v1 = vmov 0.0   ;;  %vm76_vm0 = vcmask 1043456   ;;  %v49_v2 = vld [vmem:[%s1330_s0] sm:$0xff]  ;;  %v51_v12 = vlaneseq }
  0x1d   :  { %1068 = vset.pattern.permute.xlu0 %v1155_v0  ;;  %961 = vmatprep.subr.mxu1 %v1156_v1  ;;  %v68_v3 = vld [vmem:[%s1331_s1 + $0x18] sm:$0xf]  ;;  %v67_v5 = vld [vmem:[%s1331_s1 + $0x10] sm:$0xff]  ;;  %v50_v7 = vld [vmem:[%s1330_s0 + $0x8] sm:$0xff]  ;;  %vm1157_vm1 = vmmov 0   ;;  %vm69_vm2 = vcmask 228352  }
  0x1e   :  { %54 = vperm.xlu0 %1068, %v49_v2   ;;  %950 = vmatprep.subr.msk.mxu0 %vm76_vm0, %v68_v3  ;;  %v1202_v4 = vld [vmem:[#allocation2 + $0x18] sm:$0xff]  ;;  %v1207_v6 = vld [vmem:[#allocation2 + $0x10] sm:$0xff]  ;;  %v66_v8 = vld [vmem:[%s1331_s1 + $0x8] sm:$0xff]  ;;  %v52_v13 = vand.u32 127, %v51_v12  ;;  %vm159_vm5 = vcmask 261120   ;;  %s1158_s15 = smov [#allocation7]  }
  0x1f   :  { %951 = vmatpush3.msk.msra.mxu0 %vm76_vm0, %v68_v3  ;;  %962 = vmatpush3.msra.mxu1 %v1202_v4  ;;  %v1218_v9 = vld [vmem:[#allocation2 + $0x8] sm:$0xff]  ;;  %v65_v10 = vld [vmem:[%s1331_s1] sm:$0xff]  ;;  %v786_v58 = vld [vmem:[#allocation5 + $0x18] sm:$0xff]  ;;  %s875_s16 = sshll.u32 %s1158_s15, 4  ;;  %s876_s16 = int_to_ptr.vmem [resolvable:$true] %s875_s16 }
  0x20   :  { %952 = vmatprep.subr.mxu0 %v67_v5  ;;  %963 = vmatprep.subr.mxu1 %v1156_v1  ;;  %v1224_v11 = vld [vmem:[#allocation2] sm:$0xff]  ;;  %v785_v59 = vld [vmem:[#allocation5 + $0x10] sm:$0xff]  ;;  %v784_v60 = vld [vmem:[#allocation5 + $0x8] sm:$0xff]  ;;  %s1125_s17 = scalar_lea.vmem %s876_s16, 32  ;;  %p1130_p11 = scmp.lt.s32.totalorder %s876_s16, %s876_s16 }
  0x21   :  { %953 = vmatpush3.msra.mxu0 %v67_v5  ;;  %964 = vmatpush3.msra.mxu1 %v1207_v6  ;;  %v783_v61 = vld [vmem:[#allocation5] sm:$0xff]  ;;  %p1126_p10 = scmp.ne.s32.totalorder %s876_s16, %s1125_s17  ;;  %p1131_p12 = scmp.lt.s32.totalorder %s1125_s17, %s1125_s17 }
  0x22   :  { %57 = vperm.xlu0 %1068, %v50_v7   ;;  %954 = vmatprep.subr.mxu0 %v66_v8  ;;  %v897_v5 = vld [vmem:[%s1334_s4] ss:$0 sm:$0xff] }
  0x23   :  { %965 = vmatprep.subr.mxu1 %v1156_v1  ;;  %955 = vmatpush3.msra.mxu0 %v66_v8  ;;  %p1132_p13 = por %p1131_p12, %p1130_p11 }
  0x24   :  { %966 = vmatpush3.msra.mxu1 %v1218_v9  ;;  %956 = vmatprep.subr.mxu0 %v65_v10 }
  0x25   :  { %967 = vmatprep.subr.mxu1 %v1156_v1  ;;  %957 = vmatpush3.msra.mxu0 %v65_v10  ;;  %p1133_p0 = pnand %p1132_p13, %p1126_p10 }
  0x26   :  { %968 = vmatpush3.msra.mxu1 %v1224_v11  ;;  %969 = vmatprep.mubr.msk.f32.mxu1 %vm1157_vm1, %v1156_v1 }
  0x27   :  { %970 = vmatmul.mubr.f32.vlgmr.msra.gmra.mxu1 %v1156_v1  ;;  %972 = vmatprep.subr.mxu0 %v1156_v1 }
  0x28   :  { %983 = vmatprep.subr.mxu1 %v1156_v1  ;;  %991 = vmatprep.mubr.msk.f32.mxu1 %vm1157_vm1, %v1156_v1 }
  0x29   :  { %984 = vmatpush3.msra.mxu1 %v1202_v4 }
  0x2a   :  { %985 = vmatprep.subr.mxu1 %v1156_v1 }
  0x2b   :  { %986 = vmatpush3.msra.mxu1 %v1207_v6 }
  0x2c   :  { %987 = vmatprep.subr.mxu1 %v1156_v1 }
  0x2d   :  { %988 = vmatpush3.msra.mxu1 %v1218_v9 }
  0x2e   :  { %989 = vmatprep.subr.mxu1 %v1156_v1 }
  0x2f   :  { %990 = vmatpush3.msra.mxu1 %v1224_v11 }
  0x30   :  { %1005 = vmatprep.subr.mxu1 %v1156_v1 }
  0x99   :  { %v55_v14 = vpop.permute.xlu0 %54 }
  0x9a   :  { %vm59_vm3 = vcmp.eq.s32.totalorder %v52_v13, %v55_v14 }
  0x9b   :  { %v885_v15 = vsel %vm59_vm3, 1.0, %v1156_v1 }
  0x9c   :  { %958 = vmatprep.mubr.msk.f32.mxu0 %vm69_vm2, %v885_v15 }
  0x9d   :  { %v58_v16 = vpop.permute.xlu0 %57 }
  0x9e   :  { %vm60_vm4 = vcmp.eq.s32.totalorder %v52_v13, %v58_v16 }
  0x9f   :  { %v886_v17 = vsel %vm60_vm4, 1.0, %v1156_v1 }
  0xa0   :  { %959 = vmatmul.mubr.msk.f32.vlgmr.msra.gmra.mxu0 %vm69_vm2, %v886_v17 }
  0xa1   :  { %973 = vmatpush3.msra.mxu0 %v1202_v4  ;;  %980 = vmatprep.mubr.msk.f32.mxu0 %vm1157_vm1, %v1156_v1 }
  0xa2   :  { %974 = vmatprep.subr.mxu0 %v1156_v1 }
  0xa3   :  { %975 = vmatpush3.msra.mxu0 %v1207_v6 }
  0xa4   :  { %976 = vmatprep.subr.mxu0 %v1156_v1 }
  0xa5   :  { %977 = vmatpush3.msra.mxu0 %v1218_v9 }
  0xa6   :  { %978 = vmatprep.subr.mxu0 %v1156_v1 }
  0xa7   :  { %979 = vmatpush3.msra.mxu0 %v1224_v11 }
  0xa8   :  { %994 = vmatprep.subr.mxu0 %v1156_v1 }
  0xe7   :  { %v229_v18 = vpop.f32.mrf.mxu1 }
  0xe9   :  { %v971_v19 = vpop.f32.mrf.mxu1 }
 0x160   :  { %v1256_v20 = vpop.f32.mrf.mxu0 }
 0x162   :  { %v146_v21 = vpop.f32.mrf.mxu0 }
 0x163   :  { %v233_v22 = vadd.f32 %v229_v18, %v146_v21 }
 0x165   :  { %1069 = vtanh.f32 %v233_v22 }
 0x172   :  { %v1070_v23 = vpop.eup %1069 }
 0x173   :  { %981 = vmatmul.mubr.msk.f32.vlgmr.msra.gmra.mxu0 %vm159_vm5, %v1070_v23 }
 0x174   :  { %995 = vmatpush3.msra.mxu0 %v1202_v4  ;;  %1002 = vmatprep.mubr.msk.f32.mxu0 %vm1157_vm1, %v1156_v1 }
 0x175   :  { %996 = vmatprep.subr.mxu0 %v1156_v1 }
 0x176   :  { %997 = vmatpush3.msra.mxu0 %v1207_v6 }
 0x177   :  { %998 = vmatprep.subr.mxu0 %v1156_v1 }
 0x178   :  { %999 = vmatpush3.msra.mxu0 %v1218_v9 }
 0x179   :  { %1000 = vmatprep.subr.mxu0 %v1156_v1 }
 0x17a   :  { %1001 = vmatpush3.msra.mxu0 %v1224_v11 }
 0x17b   :  { %1016 = vmatprep.subr.mxu0 %v1156_v1 }
 0x233   :  { %v304_v24 = vpop.f32.mrf.mxu0 }
 0x234   :  { %v309_v25 = vrot.slane %v304_v24, 6 }
 0x235   :  { %v982_v26 = vpop.f32.mrf.mxu0 }
 0x236   :  { %v311_v27 = vadd.f32 %v309_v25, %v146_v21 }
 0x238   :  { %1071 = vtanh.f32 %v311_v27 }
 0x245   :  { %v1072_v28 = vpop.eup %1071 }
 0x246   :  { %v314_v29 = vrot.slane %v1072_v28, 2 }
 0x248   :  { %992 = vmatmul.mubr.msk.f32.vlgmr.msra.gmra.mxu1 %vm159_vm5, %v314_v29 }
 0x249   :  { %1006 = vmatpush3.msra.mxu1 %v1202_v4  ;;  %1013 = vmatprep.mubr.msk.f32.mxu1 %vm1157_vm1, %v1156_v1 }
 0x24a   :  { %1007 = vmatprep.subr.mxu1 %v1156_v1 }
 0x24b   :  { %1008 = vmatpush3.msra.mxu1 %v1207_v6 }
 0x24c   :  { %1009 = vmatprep.subr.mxu1 %v1156_v1 }
 0x24d   :  { %1010 = vmatpush3.msra.mxu1 %v1218_v9 }
 0x24e   :  { %1011 = vmatprep.subr.mxu1 %v1156_v1 }
 0x24f   :  { %1012 = vmatpush3.msra.mxu1 %v1224_v11 }
 0x250   :  { %1027 = vmatprep.subr.mxu1 %v1156_v1 }
 0x308   :  { %v383_v30 = vpop.f32.mrf.mxu1 }
 0x309   :  { %v388_v31 = vrot.slane %v383_v30, 4 }
 0x30a   :  { %v993_v32 = vpop.f32.mrf.mxu1 }
 0x30b   :  { %v390_v33 = vadd.f32 %v388_v31, %v146_v21 }
 0x30d   :  { %1073 = vtanh.f32 %v390_v33 }
 0x31a   :  { %v1074_v34 = vpop.eup %1073 }
 0x31b   :  { %v393_v35 = vrot.slane %v1074_v34, 4 }
 0x31d   :  { %1003 = vmatmul.mubr.msk.f32.vlgmr.msra.gmra.mxu0 %vm159_vm5, %v393_v35 }
 0x31e   :  { %1017 = vmatpush3.msra.mxu0 %v1202_v4  ;;  %1024 = vmatprep.mubr.msk.f32.mxu0 %vm1157_vm1, %v1156_v1 }
 0x31f   :  { %1018 = vmatprep.subr.mxu0 %v1156_v1 }
 0x320   :  { %1019 = vmatpush3.msra.mxu0 %v1207_v6 }
 0x321   :  { %1020 = vmatprep.subr.mxu0 %v1156_v1 }
 0x322   :  { %1021 = vmatpush3.msra.mxu0 %v1218_v9 }
 0x323   :  { %1022 = vmatprep.subr.mxu0 %v1156_v1 }
 0x324   :  { %1023 = vmatpush3.msra.mxu0 %v1224_v11 }
 0x325   :  { %1038 = vmatprep.subr.mxu0 %v1156_v1 }
 0x3dd   :  { %v462_v36 = vpop.f32.mrf.mxu0 }
 0x3de   :  { %v467_v37 = vrot.slane %v462_v36, 2 }
 0x3df   :  { %v1004_v38 = vpop.f32.mrf.mxu0 }
 0x3e0   :  { %v469_v39 = vadd.f32 %v467_v37, %v146_v21 }
 0x3e2   :  { %1075 = vtanh.f32 %v469_v39 }
 0x3ef   :  { %v1076_v40 = vpop.eup %1075 }
 0x3f0   :  { %v472_v41 = vrot.slane %v1076_v40, 6 }
 0x3f2   :  { %1014 = vmatmul.mubr.msk.f32.vlgmr.msra.gmra.mxu1 %vm159_vm5, %v472_v41 }
 0x3f3   :  { %1028 = vmatpush3.msra.mxu1 %v1202_v4  ;;  %1035 = vmatprep.mubr.msk.f32.mxu1 %vm1157_vm1, %v1156_v1 }
 0x3f4   :  { %1029 = vmatprep.subr.mxu1 %v1156_v1 }
 0x3f5   :  { %1030 = vmatpush3.msra.mxu1 %v1207_v6 }
 0x3f6   :  { %1031 = vmatprep.subr.mxu1 %v1156_v1 }
 0x3f7   :  { %1032 = vmatpush3.msra.mxu1 %v1218_v9 }
 0x3f8   :  { %1033 = vmatprep.subr.mxu1 %v1156_v1 }
 0x3f9   :  { %1034 = vmatpush3.msra.mxu1 %v1224_v11 }
 0x3fa   :  { %1049 = vmatprep.subr.mxu1 %v1156_v1 }
 0x4b2   :  { %v541_v42 = vpop.f32.mrf.mxu1 }
 0x4b3   :  { %v545_v43 = vadd.f32 %v1256_v20, %v541_v42 }
 0x4b4   :  { %v1015_v44 = vpop.f32.mrf.mxu1 }
 0x4b5   :  { %1077 = vtanh.f32 %v545_v43 }
 0x4c2   :  { %v1078_v45 = vpop.eup %1077 }
 0x4c3   :  { %1025 = vmatmul.mubr.msk.f32.vlgmr.msra.gmra.mxu0 %vm159_vm5, %v1078_v45 }
 0x4c4   :  { %1039 = vmatpush3.msra.mxu0 %v1202_v4  ;;  %1046 = vmatprep.mubr.msk.f32.mxu0 %vm1157_vm1, %v1156_v1 }
 0x4c5   :  { %1040 = vmatprep.subr.mxu0 %v1156_v1 }
 0x4c6   :  { %1041 = vmatpush3.msra.mxu0 %v1207_v6 }
 0x4c7   :  { %1042 = vmatprep.subr.mxu0 %v1156_v1 }
 0x4c8   :  { %1043 = vmatpush3.msra.mxu0 %v1218_v9 }
 0x4c9   :  { %1044 = vmatprep.subr.mxu0 %v1156_v1 }
 0x4ca   :  { %1045 = vmatpush3.msra.mxu0 %v1224_v11 }
 0x583   :  { %v616_v46 = vpop.f32.mrf.mxu0 }
 0x584   :  { %v621_v47 = vrot.slane %v616_v46, 6 }
 0x585   :  { %v1026_v48 = vpop.f32.mrf.mxu0 }
 0x586   :  { %v623_v49 = vadd.f32 %v1256_v20, %v621_v47 }
 0x588   :  { %1079 = vtanh.f32 %v623_v49 }
 0x595   :  { %v1080_v50 = vpop.eup %1079 }
 0x596   :  { %v626_v51 = vrot.slane %v1080_v50, 2 }
 0x598   :  { %1036 = vmatmul.mubr.msk.f32.vlgmr.msra.gmra.mxu1 %vm159_vm5, %v626_v51 }
 0x599   :  { %1057 = vmatprep.mubr.msk.f32.mxu1 %vm1157_vm1, %v1156_v1  ;;  %1050 = vmatpush3.msra.mxu1 %v786_v58 }
 0x59a   :  { %1051 = vmatprep.subr.mxu1 %v1156_v1 }
 0x59b   :  { %1052 = vmatpush3.msra.mxu1 %v785_v59 }
 0x59c   :  { %1053 = vmatprep.subr.mxu1 %v1156_v1 }
 0x59d   :  { %1054 = vmatpush3.msra.mxu1 %v784_v60 }
 0x59e   :  { %1055 = vmatprep.subr.mxu1 %v1156_v1 }
 0x59f   :  { %1056 = vmatpush3.msra.mxu1 %v783_v61 }
 0x658   :  { %v695_v52 = vpop.f32.mrf.mxu1 }
 0x659   :  { %v700_v53 = vrot.slane %v695_v52, 4 }
 0x65a   :  { %v1037_v54 = vpop.f32.mrf.mxu1 }
 0x65b   :  { %v702_v55 = vadd.f32 %v1256_v20, %v700_v53 }
 0x65d   :  { %1081 = vtanh.f32 %v702_v55 }
 0x66a   :  { %v1082_v56 = vpop.eup %1081 }
 0x66b   :  { %v705_v57 = vrot.slane %v1082_v56, 4 }
 0x66d   :  { %1047 = vmatmul.mubr.msk.f32.vlgmr.msra.gmra.mxu0 %vm159_vm5, %v705_v57 }
 0x72d   :  { %v774_v62 = vpop.f32.mrf.mxu0 }
 0x72e   :  { %v779_v63 = vrot.slane %v774_v62, 2 }
 0x72f   :  { %v1048_v0 = vpop.f32.mrf.mxu0 }
 0x730   :  { %v781_v2 = vadd.f32 %v1256_v20, %v779_v63 }
 0x732   :  { %1083 = vtanh.f32 %v781_v2 }
 0x73f   :  { %v1084_v3 = vpop.eup %1083 }
 0x740   :  { %v795_v4 = vrot.slane %v1084_v3, 6 }
 0x742   :  { %1058 = vmatmul.mubr.msk.f32.vlgmr.msra.gmra.mxu1 %vm159_vm5, %v795_v4 }
 0x802   :  { %v864_v6 = vpop.f32.mrf.mxu1 }
 0x803   :  { %v865_v1 = vadd.f32 %v897_v5, %v864_v6 }
 0x804   :  { %v1059_v7 = vpop.f32.mrf.mxu1 }
 0x805   :  { %868 = vst [vmem:[#allocation7] sm:$0x3] %v865_v1 }
 0x806   :  { %1136 = shalt.err (!%p1133_p0)
}
 0x807   :  { %878 = dma.vmem_to_hbm [thread:$0]  %s876_s16, 32, %s1335_s5, [#allocation4]  }
 0x808   :  { %1149 = dma.done.wait [#allocation4], 32  }
 0x809   :  { %1150 = vsyncadd [#allocation4], 4294967264 }
 0x80a   :  { %882 = vsyncpa [#allocation3], 1 }
 0x80b   :  { %883 = vsyncpa [#allocation6], 1 }
 0x80c   :  { %884 = vsyncpa [#allocation4], 1 }

</bundles_post_ra>
